<compile_context>
chip_gen: v6e
topology: v6e:2x2x1
jax: 0.10.0
libtpu: 0.0.40
codegen_flags: <defaults>
</compile_context>

<pallas_src>
import jax
import jax.numpy as jnp
from jax.experimental import pallas as pl
from jax.experimental.pallas import tpu as pltpu

CONV_SCALE = 0.0039
RELU_SCALE = 0.0078
QMIN = 0.0
QMAX = 255.0


def conv1x1_relu_quant_kernel(w_ref, x_ref, o_ref):
    # w_ref: (Cout, Cin) f32, requant scale pre-folded; resident across grid.
    # x_ref: (Cin, THW)  f32
    # o_ref: (Cout, THW) f32 (lane-dense spatial minor dim)
    acc = jnp.dot(w_ref[...], x_ref[...], preferred_element_type=jnp.float32)
    # acc == conv_out * conv_scale / relu_scale (scale already folded into w).
    # ReLU folded into the clamp's 0 lower bound (both scales are positive).
    q = jnp.clip(jnp.round(acc), QMIN, QMAX)
    o_ref[...] = (RELU_SCALE * q).astype(o_ref.dtype)


def _round_up(x, m):
    return ((x + m - 1) // m) * m


def conv2d_relu_int(x_nchw, weight_oihw, *, thw_max=8192):
    """x_nchw: [N, Cin, H, W] f32 (integer-valued quantized activations);
    weight_oihw: [Cout, Cin, 1, 1] f32.  Returns [N, Cout, H, W] f32."""
    N, Cin, H, W = x_nchw.shape
    Cout = weight_oihw.shape[0]
    HW = H * W

    # 1x1 conv in native NCHW == per-sample channel matmul over H*W columns.
    x3 = x_nchw.reshape(N, Cin, HW)                  # free view, stays f32

    # Fold dequant+requant scaling into the tiny weight (one-time 64x64 op;
    # conv_scale/relu_scale is exactly 0.5 in f32, so this is an exact scale).
    w_mat = weight_oihw.reshape(Cout, Cin) * (CONV_SCALE / RELU_SCALE)

    # Spatial tile: lane-dense multiple of 128; ragged last tile masked by Pallas.
    thw = min(thw_max, _round_up(HW, 128))
    # Keep >= 2 grid steps so both of v7x's TensorCores get work.
    if N * pl.cdiv(HW, thw) < 2 and HW > 128:
        thw = _round_up(pl.cdiv(HW, 2), 128)
    grid = (N, pl.cdiv(HW, thw))

    out3 = pl.pallas_call(
        conv1x1_relu_quant_kernel,
        out_shape=jax.ShapeDtypeStruct((N, Cout, HW), jnp.float32),
        grid_spec=pltpu.PrefetchScalarGridSpec(
            num_scalar_prefetch=0,
            grid=grid,
            in_specs=[
                # Weight: constant block index -> DMA'd once, resident across grid.
                pl.BlockSpec((Cout, Cin), lambda n, j: (0, 0)),
                # Activations: one sample, one spatial tile per grid step.
                pl.BlockSpec((None, Cin, thw), lambda n, j: (n, 0, j)),
            ],
            out_specs=pl.BlockSpec((None, Cout, thw), lambda n, j: (n, 0, j)),
        ),
        compiler_params=pltpu.CompilerParams(
            dimension_semantics=("parallel", "parallel")),
    )(w_mat, x3)

    return out3.reshape(N, Cout, H, W)


def _reference(x_nchw, weight_oihw):
    # Pure-JAX mirror of the PyTorch forward (unfused, f32, high precision).
    Cout, Cin = weight_oihw.shape[0], weight_oihw.shape[1]
    w = weight_oihw.reshape(Cout, Cin)
    out_int = jnp.einsum("nchw,oc->nohw", x_nchw, w,
                         precision=jax.lax.Precision.HIGHEST)
    out_f = out_int * CONV_SCALE
    out_f = jnp.maximum(out_f, 0.0)
    return RELU_SCALE * jnp.clip(jnp.round(out_f / RELU_SCALE), QMIN, QMAX)


if __name__ == "__main__":
    key = jax.random.PRNGKey(0)
    kx, kw = jax.random.split(key)

    # Module hardcodes Conv2d(64, 64, k=1); keep spatial small but lane-friendly.
    N, Cin, Cout, H, W = 2, 64, 64, 16, 16

    # int-like activations (quantized-model style), stored as f32
    x = jax.random.randint(kx, (N, Cin, H, W), 0, 256).astype(jnp.float32)
    # Conv2d default init: kaiming-uniform -> U(-1/sqrt(fan_in), 1/sqrt(fan_in))
    bound = 1.0 / jnp.sqrt(jnp.float32(Cin * 1 * 1))
    weight = jax.random.uniform(
        kw, (Cout, Cin, 1, 1), jnp.float32, minval=-bound, maxval=bound)

    out = conv2d_relu_int(x, weight)
    out = jax.block_until_ready(out)
    ref = _reference(x, weight)

    assert out.shape == (N, Cout, H, W)
    diff = jnp.abs(out - ref)
    # Exact up to (at most) extremely rare one-requant-level flips caused by
    # f32 op-ordering differences (scale folded into weights vs. two-step).
    assert float(jnp.max(diff)) <= RELU_SCALE + 1e-5
    assert float(jnp.mean((diff > 1e-5).astype(jnp.float32))) < 1e-3

    print("KERNEL_OK")
</pallas_src>

<mosaic_0001>
module attributes {stable_mosaic.version = 11 : i64} {
  func.func @conv1x1_relu_quant_kernel(%arg0: i32, %arg1: i32, %arg2: memref<64x64xf32, #tpu.memory_space<vmem>>, %arg3: memref<1x64x256xf32, #tpu.memory_space<vmem>>, %arg4: memref<1x64x256xf32, #tpu.memory_space<vmem>>) attributes {dimension_semantics = [#tpu.dimension_semantics<parallel>, #tpu.dimension_semantics<parallel>], iteration_bounds = array<i64: 2, 1>, scalar_prefetch = 0 : i64, scratch_operands = 0 : i64, tpu.core_type = #tpu.core_type<tc>, window_params = [{pipeline_mode = #tpu.pipeline_mode<synchronous>, transform_indices = @transform_0, window_bounds = array<i64: 64, 64>}, {transform_indices = @transform_1, window_bounds = array<i64: 1, 64, 256>}, {transform_indices = @transform_2, window_bounds = array<i64: 1, 64, 256>}]} {
    %c0 = arith.constant 0 : index
    %c0_0 = arith.constant 0 : index
    %0 = vector.load %arg2[%c0, %c0_0] : memref<64x64xf32, #tpu.memory_space<vmem>>, vector<64x64xf32>
    %c0_1 = arith.constant 0 : index
    %c0_2 = arith.constant 0 : index
    %c0_3 = arith.constant 0 : index
    %1 = vector.load %arg3[%c0_1, %c0_2, %c0_3] : memref<1x64x256xf32, #tpu.memory_space<vmem>>, vector<1x64x256xf32>
    %2 = vector.shape_cast %1 : vector<1x64x256xf32> to vector<64x256xf32>
    %cst = arith.constant dense<0.000000e+00> : vector<64x256xf32>
    %3 = tpu.matmul %0, %2, %cst {dimension_numbers = #tpu.dot_dimension_numbers<[1], [0], [0], [1], [0, 0, 1, 1], [], []>} : vector<64x64xf32>, vector<64x256xf32>, vector<64x256xf32> -> vector<64x256xf32>
    %4 = math.roundeven %3 : vector<64x256xf32>
    %cst_4 = arith.constant 0.000000e+00 : f32
    %cst_5 = arith.constant 2.550000e+02 : f32
    %5 = vector.broadcast %cst_4 : f32 to vector<64x256xf32>
    %6 = arith.maximumf %5, %4 : vector<64x256xf32>
    %7 = vector.broadcast %cst_5 : f32 to vector<64x256xf32>
    %8 = arith.minimumf %7, %6 : vector<64x256xf32>
    %cst_6 = arith.constant 0.00779999978 : f32
    %9 = vector.broadcast %cst_6 : f32 to vector<64x256xf32>
    %10 = arith.mulf %9, %8 : vector<64x256xf32>
    %c0_7 = arith.constant 0 : index
    %c0_8 = arith.constant 0 : index
    %c0_9 = arith.constant 0 : index
    %11 = vector.load %arg4[%c0_7, %c0_8, %c0_9] : memref<1x64x256xf32, #tpu.memory_space<vmem>>, vector<1x64x256xf32>
    %12 = vector.shape_cast %11 : vector<1x64x256xf32> to vector<64x256xf32>
    %13 = vector.shape_cast %10 : vector<64x256xf32> to vector<1x64x256xf32>
    tpu.vector_store %arg4[%c0_7, %c0_8, %c0_9], %13 {strides = array<i32>} : memref<1x64x256xf32, #tpu.memory_space<vmem>>, vector<1x64x256xf32>,
    return
  }
  func.func @transform_0(%arg0: i32, %arg1: i32) -> (i32, i32) {
    %c0_i32 = arith.constant 0 : i32
    %c0_i32_0 = arith.constant 0 : i32
    %c0_i32_1 = arith.constant 0 : i32
    return %c0_i32, %c0_i32_0 : i32, i32
  }
  func.func @transform_1(%arg0: i32, %arg1: i32) -> (i32, i32, i32) {
    %c0_i32 = arith.constant 0 : i32
    %c0_i32_0 = arith.constant 0 : i32
    return %arg0, %c0_i32, %arg1 : i32, i32, i32
  }
  func.func @transform_2(%arg0: i32, %arg1: i32) -> (i32, i32, i32) {
    %c0_i32 = arith.constant 0 : i32
    %c0_i32_0 = arith.constant 0 : i32
    return %arg0, %c0_i32, %arg1 : i32, i32, i32
  }
}

</mosaic_0001>

<bundles_post_ra>
// kernel: tpu_custom_call.1
= control target key start
LH: loop header
LB: loop body
LE: loop exit
PB: predicated region body
PF: predicated region fallthrough
CT: control target
= control target key end

     0   :  { %7 = vsyncpa [#allocation3], 0  ;;  %s1262_s0 = inlined_call_operand.hbm [shape: f32[64,64], index: 0, kind: input, shape index: {}]   ;;  %s1263_s1 = inlined_call_operand.hbm [shape: f32[2,64,256], index: 1, kind: input, shape index: {}]   ;;  %s1264_s2 = inlined_call_operand.hbm [shape: f32[2,64,256], index: 2, kind: output, shape index: {}]  }
   0x1   :  { %8 = vsyncpa [#allocation6], 0 }
   0x2   :  { %10 = vsyncpa [#allocation6 + $0x1], 0 }
   0x3   :  { %11 = vsyncpa [#allocation4], 0 }
   0x4   :  { %13 = vsyncpa [#allocation4 + $0x1], 0  ;;  %s970_s9 = smov 0   ;;  %s972_s10 = smov 0  }
   0x5   :  { %s974_s11 = smov 0   ;;  %s976_s12 = smov 0  }
   0x6   :  { %s978_s13 = smov 0   ;;  %s980_s14 = smov 0  }
   0x7 LB: > { %s554_s15 = sadd.s32 4294967295, %s943_s14   ;;  %s555_s16 = sadd.s32 4294967294, %s943_s14   ;;  %s943_s14 = sphi %s980_s14, %s19_s14   ;;  %s939_s13 = sphi %s978_s13, %s1300_s13   ;;  %s935_s12 = sphi %s976_s12, %s1299_s12   ;;  %s931_s11 = sphi %s974_s11, %s1298_s11   ;;  %s927_s10 = sphi %s972_s10, %s1297_s10   ;;  %s923_s9 = sphi %s970_s9, %s1296_s9  }
   0x8   : > { %p74_p0 = scmp.ne.s32.totalorder %s927_s10, %s923_s9  ;;  %p1004_p1 = scmp.eq.s32.totalorder %s554_s15, 0 }
   0x9   : > { %p1008_p2 = scmp.eq.s32.totalorder %s554_s15, 1  ;;  %p106_p3 = scmp.eq.s32.totalorder %s555_s16, 1 }
   0xa   : > { %p1014_p4 = por %p1004_p1, %p74_p0  ;;  %p556_p5 = scmp.ge.s32.totalorder %s943_s14, 1 }
   0xb   : > { %p1019_p6 = por %p106_p3, %p74_p0  ;;  %p113_p7 = scmp.lt.s32.totalorder %s943_s14, 3 }
   0xc   : > { %s1268_s19 = scalar_select %p1014_p4, 1, 0 }
   0xd   : > { %s1269_s20 = scalar_select %p1019_p6, 1, 0 }
   0xe   : > { %p1024_p8 = pnand %p556_p5, %p113_p7  ;;  %s945_s22 = smov [#allocation2]  }
   0xf   : > { %s125_s23 = sshll.u32 %s945_s22, 4  ;;  %s31_s25 = sadd.s32 1, %s939_s13  ;;  %s126_s23 = int_to_ptr.vmem [resolvable:$true] %s125_s23 }
  0x10   : > { %p733_p9 = pneg %p1024_p8  ;;  %s816_s26 = scalar_lea.vmem %s126_s23, 1024 }
  0x11   : > { %p817_p13 = scmp.ne.s32.totalorder %s126_s23, %s816_s26  ;;  %p824_p5 = scmp.lt.s32.totalorder %s126_s23, %s126_s23 }
  0x12   : > { %p1033_p11 = pnand %p733_p9, %p1004_p1  ;;  %p825_p7 = scmp.lt.s32.totalorder %s816_s26, %s816_s26 }
  0x14   : > { %p807_p12 = pneg %p1033_p11  ;;  %p826_p6 = por %p825_p7, %p824_p5 }
  0x16   : > { %p819_p0 = pnand %p817_p13, %p807_p12 }
  0x18   : > { %p820_p3 = pneg %p819_p0 }
  0x1a   : > { %p827_p4 = pnand %p826_p6, %p820_p3 }
  0x1c   : > { %830 = shalt.err (!%p827_p4)
}
  0x1d   : > { %s946_s27 = smov 128   ;;  %s947_s28 = smov 8  }
  0x1e   : > { %736 = dma.hbm_to_vmem [thread:$0]  (!%p1033_p11), %s1262_s0, 1024, %s126_s23, [#allocation3], %s946_s27, %s946_s27, %s947_s28  }
  0x1f   : > { %p33_p6 = scmp.ge.s32.totalorder %s31_s25, 2  ;;  %s61_s3 = sadd.s32 1, %s931_s11 }
  0x20   : > { %p68_p4 = scmp.ne.s32.totalorder %s931_s11, %s927_s10  ;;  %p69_p9 = scmp.eq.s32.totalorder %s943_s14, 0 }
  0x21   : > { %s1302_s25 = smov (%p33_p6, %s31_s25), 0  ;;  %p746_p0 = scmp.lt.s32.totalorder %s943_s14, 2 }
  0x22   : > { %p1051_p12 = por %p69_p9, %p68_p4  ;;  %p1057_p13 = por %p1008_p2, %p68_p4 }
  0x23   : > { %s56_s6 = ssub.s32 %s939_s13, %s1302_s25  ;;  %s139_s7 = sand.u32 1, %s931_s11  }
  0x24   : > { %p59_p11 = scmp.eq.s32.totalorder %s56_s6, 0  ;;  %s559_s8 = sshll.u32 %s139_s7, 7 }
  0x25   : > { %s579_s16 = sshll.u32 %s939_s13, 11  ;;  %s143_s26 = scalar_lea.vmem [#allocation5], %s559_s8 }
  0x26   : > { %s1066_s15 = scalar_select %p59_p11, %s931_s11, %s61_s3  }
  0x27   : > { %s151_s24 = scalar_lea.hbm %s1263_s1, %s579_s16  ;;  %s152_s27 = sshll.u32 %s143_s26, 4  ;;  %s153_s27 = int_to_ptr.vmem [resolvable:$true] %s152_s27 }
  0x28   : > { %p1074_p2 = pnand %p746_p0, %p1051_p12  ;;  %s140_s28 = scalar_lea.sflag [#allocation6], %s139_s7 }
  0x29   : > { %s844_s29 = scalar_lea.vmem %s153_s27, 2048  ;;  %s948_s30 = smov [#allocation5]  }
  0x2a   : > { %p833_p3 = pneg %p1074_p2  ;;  %p845_p5 = scmp.ne.s32.totalorder %s153_s27, %s844_s29 }
  0x2b   : > { %s849_s3 = sshll.u32 %s948_s30, 4  ;;  %s850_s3 = int_to_ptr.vmem [resolvable:$false] %s849_s3 }
  0x2c   : > { %p847_p7 = pnand %p845_p5, %p833_p3  ;;  %s851_s6 = scalar_lea.vmem %s850_s3, 4096 }
  0x2d   : > { %p852_p4 = scmp.lt.s32.totalorder %s153_s27, %s850_s3  ;;  %p853_p9 = scmp.lt.s32.totalorder %s851_s6, %s844_s29 }
  0x2e   : > { %p848_p6 = pneg %p847_p7 }
  0x2f   : > { %p854_p11 = por %p853_p9, %p852_p4 }
  0x31   : > { %p855_p10 = pnand %p854_p11, %p848_p6 }
  0x33   : > { %858 = shalt.err (!%p855_p10)
}
  0x34   : > { %s949_s4 = smov 256   ;;  %s950_s8 = smov 16  }
  0x35   : > { %740 = dma.hbm_to_vmem [thread:$0]  (!%p1074_p2), %s151_s24, 2048, %s153_s27, %s140_s28, %s949_s4, %s949_s4, %s950_s8  }
  0x36   : > { %164 = sbr.rel (%p1024_p8) target bundleno = 340 (0x154), region = 28 }
  0x3b   : > { %910 = dma.done.wait (%p1004_p1), [#allocation3], 1024  }
  0x3c   : > { %912 = vsyncadd (%p1004_p1), [#allocation3], 4294966272  ;;  %s1089_s7 = sand.u32 1, %s927_s10   ;;  %p1275_p10 = scmp.ne.s32.totalorder %s1268_s19, 0 }
  0x3d   : > { %s564_s16 = sshll.u32 %s1089_s7, 7  ;;  %s171_s22 = scalar_lea.sflag [#allocation6], %s1089_s7 }
  0x3e   : > { %s1095_s23 = scalar_lea.vmem [#allocation5], %s564_s16 }
  0x3f   : > { %914 = dma.done.wait (%p1275_p10), %s171_s22, 2048  }
  0x40   : > { %916 = vsyncadd (%p1275_p10), %s171_s22, 4294965248  ;;  %v951_v0 = vmov 0.0   ;;  %v220_v1 = vld [vmem:[%s1095_s23 + $0x78] sm:$0xff]  ;;  %v219_v2 = vld [vmem:[%s1095_s23 + $0x70] sm:$0xff]  ;;  %vm221_vm0 = vcmask 523264   ;;  %s1165_s17 = scalar_lea.vmem [#allocation7], %s564_s16 }
  0x41   : > { %310 = vmatprep.mubr.f32.mxu0 %v951_v0  ;;  %334 = vmatprep.mubr.f32.mxu1 %v951_v0  ;;  %v218_v3 = vld [vmem:[%s1095_s23 + $0x68] sm:$0xff]  ;;  %v217_v4 = vld [vmem:[%s1095_s23 + $0x60] sm:$0xff]  ;;  %v216_v5 = vld [vmem:[%s1095_s23 + $0x58] sm:$0xff]  ;;  %s580_s19 = sshll.u32 %s935_s12, 11  ;;  %s455_s21 = sshll.u32 %s1165_s17, 4  ;;  %s1212_s21 = int_to_ptr.vmem [resolvable:$true] %s455_s21 }
  0x42   : > { %262 = vmatprep.subr.mxu0 %v220_v1  ;;  %581 = vmatprep.subr.mxu1 %v220_v1  ;;  %v215_v6 = vld [vmem:[%s1095_s23 + $0x50] sm:$0xff]  ;;  %v214_v7 = vld [vmem:[%s1095_s23 + $0x48] sm:$0xff]  ;;  %v213_v8 = vld [vmem:[%s1095_s23 + $0x40] sm:$0xff]  ;;  %s1210_s27 = scalar_lea.hbm %s1264_s2, %s580_s19  ;;  %s440_s18 = scalar_lea.sflag [#allocation4], %s1089_s7 }
  0x43   : > { %263 = vmatpush1.msra.mxu0 %v219_v2  ;;  %589 = vmatpush1.msra.mxu1 %v219_v2  ;;  %v212_v9 = vld [vmem:[%s1095_s23 + $0x38] sm:$0xff]  ;;  %v211_v10 = vld [vmem:[%s1095_s23 + $0x30] sm:$0xff]  ;;  %v210_v11 = vld [vmem:[%s1095_s23 + $0x28] sm:$0xff]  ;;  %s859_s28 = scalar_lea.vmem %s1212_s21, 2048  ;;  %s952_s12 = smov [#allocation7]  }
  0x44   : > { %264 = vmatprep.subr.mxu0 %v218_v3  ;;  %582 = vmatprep.subr.mxu1 %v218_v3  ;;  %v209_v12 = vld [vmem:[%s1095_s23 + $0x20] sm:$0xff]  ;;  %v208_v13 = vld [vmem:[%s1095_s23 + $0x18] sm:$0xff]  ;;  %v207_v14 = vld [vmem:[%s1095_s23 + $0x10] sm:$0xff]  ;;  %p860_p1 = scmp.ne.s32.totalorder %s1212_s21, %s859_s28  ;;  %s863_s29 = sshll.u32 %s952_s12, 4  ;;  %s864_s29 = int_to_ptr.vmem [resolvable:$false] %s863_s29 }
  0x45   : > { %265 = vmatpush1.msra.mxu0 %v217_v4  ;;  %590 = vmatpush1.msra.mxu1 %v217_v4  ;;  %v206_v15 = vld [vmem:[%s1095_s23 + $0x8] sm:$0xff]  ;;  %v205_v16 = vld [vmem:[%s1095_s23] sm:$0xff]  ;;  %v199_v21 = vld [vmem:[#allocation2 + $0x10] sm:$0xff]  ;;  %s865_s30 = scalar_lea.vmem %s864_s29, 4096  ;;  %p866_p0 = scmp.lt.s32.totalorder %s1212_s21, %s864_s29 }
  0x46   : > { %266 = vmatprep.subr.mxu0 %v216_v5  ;;  %583 = vmatprep.subr.mxu1 %v216_v5  ;;  %v197_v17 = vld [vmem:[#allocation2] sm:$0xff]  ;;  %v198_v19 = vld [vmem:[#allocation2 + $0x8] sm:$0xff]  ;;  %v203_v22 = vld [vmem:[#allocation2 + $0x30] sm:$0xff]  ;;  %p861_p8 = pnand %p860_p1, %p1057_p13  ;;  %p867_p2 = scmp.lt.s32.totalorder %s865_s30, %s859_s28 }
  0x47   : > { %267 = vmatpush1.msra.mxu0 %v215_v6  ;;  %591 = vmatpush1.msra.mxu1 %v215_v6  ;;  %v201_v18 = vld [vmem:[#allocation2 + $0x20] sm:$0xff]  ;;  %v202_v20 = vld [vmem:[#allocation2 + $0x28] sm:$0xff]  ;;  %v200_v23 = vld [vmem:[#allocation2 + $0x18] sm:$0xff] }
  0x48   : > { %268 = vmatprep.subr.mxu0 %v214_v7  ;;  %584 = vmatprep.subr.mxu1 %v214_v7  ;;  %v204_v24 = vld [vmem:[#allocation2 + $0x38] sm:$0xff]  ;;  %p862_p12 = pneg %p861_p8  ;;  %p868_p3 = por %p867_p2, %p866_p0 }
  0x49   : > { %269 = vmatpush1.msra.mxu0 %v213_v8  ;;  %592 = vmatpush1.msra.mxu1 %v213_v8 }
  0x4a   : > { %270 = vmatprep.subr.mxu0 %v212_v9  ;;  %585 = vmatprep.subr.mxu1 %v212_v9  ;;  %p869_p5 = pnand %p868_p3, %p862_p12 }
  0x4b   : > { %271 = vmatpush1.msra.mxu0 %v211_v10  ;;  %593 = vmatpush1.msra.mxu1 %v211_v10 }
  0x4c   : > { %272 = vmatprep.subr.mxu0 %v210_v11  ;;  %586 = vmatprep.subr.mxu1 %v210_v11 }
  0x4d   : > { %273 = vmatpush1.msra.mxu0 %v209_v12  ;;  %594 = vmatpush1.msra.mxu1 %v209_v12 }
  0x4e   : > { %274 = vmatprep.subr.mxu0 %v208_v13  ;;  %587 = vmatprep.subr.mxu1 %v208_v13 }
  0x4f   : > { %275 = vmatpush1.msra.mxu0 %v207_v14  ;;  %595 = vmatpush1.msra.mxu1 %v207_v14 }
  0x50   : > { %276 = vmatprep.subr.mxu0 %v206_v15  ;;  %588 = vmatprep.subr.mxu1 %v206_v15 }
  0x51   : > { %277 = vmatpush1.msra.mxu0 %v205_v16  ;;  %596 = vmatpush1.msra.mxu1 %v205_v16 }
  0x52   : > { %566 = vmatmul.mubr.msk.f32.vlgmr.msra.gmra.mxu0 %vm221_vm0, %v197_v17  ;;  %570 = vmatmul.mubr.msk.f32.vlgmr.msra.gmra.mxu1 %vm221_vm0, %v201_v18 }
  0x53   : > { %316 = vmatprep.mubr.f32.mxu0 %v951_v0  ;;  %340 = vmatprep.mubr.f32.mxu1 %v951_v0 }
  0x56   : > { %567 = vmatmul.mubr.msk.f32.gmra.mxu0 %vm221_vm0, %v198_v19  ;;  %571 = vmatmul.mubr.msk.f32.gmra.mxu1 %vm221_vm0, %v202_v20 }
  0x57   : > { %322 = vmatprep.mubr.f32.mxu0 %v951_v0  ;;  %346 = vmatprep.mubr.f32.mxu1 %v951_v0 }
  0x5a   : > { %568 = vmatmul.mubr.msk.f32.gmra.mxu0 %vm221_vm0, %v199_v21  ;;  %572 = vmatmul.mubr.msk.f32.gmra.mxu1 %vm221_vm0, %v203_v22 }
  0x5b   : > { %328 = vmatprep.mubr.f32.mxu0 %v951_v0  ;;  %352 = vmatprep.mubr.f32.mxu1 %v951_v0 }
  0x5e   : > { %569 = vmatmul.mubr.msk.f32.gmra.mxu0 %vm221_vm0, %v200_v23  ;;  %573 = vmatmul.mubr.msk.f32.gmra.mxu1 %vm221_vm0, %v204_v24 }
 0x112   : > { %v312_v25 = vpop.f32.mrf.mxu0  ;;  %v336_v26 = vpop.f32.mrf.mxu1 }
 0x113   : > { %v597_v27 = vand.u32 2147483647, %v312_v25  ;;  %v599_v28 = vcvt.f32.s32 %v312_v25  ;;  %v661_v29 = vand.u32 2147483647, %v336_v26  ;;  %v663_v30 = vcvt.f32.s32 %v336_v26 }
 0x114   : > { %v314_v31 = vpop.f32.mrf.mxu0  ;;  %v338_v32 = vpop.f32.mrf.mxu1  ;;  %v602_v34 = vand.u32 2147483648, %v312_v25  ;;  %v666_v37 = vand.u32 2147483648, %v336_v26 }
 0x115   : > { %v600_v33 = vcvt.s32.f32 %v599_v28  ;;  %v605_v35 = vand.u32 2147483647, %v314_v31  ;;  %v664_v36 = vcvt.s32.f32 %v663_v30  ;;  %v607_v38 = vcvt.f32.s32 %v314_v31 }
 0x116   : > { %v669_v39 = vand.u32 2147483647, %v338_v32  ;;  %v318_v40 = vpop.f32.mrf.mxu0  ;;  %vm1133_vm1 = vcmp.lt.f32.partialorder %v597_v27, 8388608.0  ;;  %vm1137_vm2 = vcmp.lt.f32.partialorder %v661_v29, 8388608.0  ;;  %v671_v44 = vcvt.f32.s32 %v338_v32  ;;  %v342_v49 = vpop.f32.mrf.mxu1 }
 0x117   : > { %v601_v42 = vand.u32 2147483647, %v600_v33  ;;  %v665_v45 = vand.u32 2147483647, %v664_v36  ;;  %vm1141_vm3 = vcmp.lt.f32.partialorder %v605_v35, 8388608.0  ;;  %v608_v47 = vcvt.s32.f32 %v607_v38 }
 0x118   : > { %v610_v48 = vand.u32 2147483648, %v314_v31  ;;  %v672_v51 = vcvt.s32.f32 %v671_v44  ;;  %v674_v52 = vand.u32 2147483648, %v338_v32  ;;  %v615_v53 = vcvt.f32.s32 %v318_v40  ;;  %v320_v10 = vpop.f32.mrf.mxu0  ;;  %v344_v19 = vpop.f32.mrf.mxu1 }
 0x119   : > { %v603_v50 = vor.u32 %v602_v34, %v601_v42  ;;  %v667_v54 = vor.u32 %v666_v37, %v665_v45  ;;  %v609_v55 = vand.u32 2147483647, %v608_v47  ;;  %vm1145_vm4 = vcmp.lt.f32.partialorder %v669_v39, 8388608.0 }
 0x11a   : > { %v613_v57 = vand.u32 2147483647, %v318_v40  ;;  %v673_v59 = vand.u32 2147483647, %v672_v51  ;;  %v616_v60 = vcvt.s32.f32 %v615_v53  ;;  %v679_v61 = vcvt.f32.s32 %v342_v49  ;;  %v348_v36 = vpop.f32.mrf.mxu1 }
 0x11b   : > { %v604_v58 = vsel %vm1133_vm1, %v603_v50, %v312_v25  ;;  %v668_v63 = vsel %vm1137_vm2, %v667_v54, %v336_v26  ;;  %v611_v0 = vor.u32 %v610_v48, %v609_v55  ;;  %v618_v1 = vand.u32 2147483648, %v318_v40 }
 0x11c   : > { %v375_v62 = vmax.f32 %v604_v58, 0.0  ;;  %v383_v2 = vmax.f32 %v668_v63, 0.0  ;;  %v675_v3 = vor.u32 %v674_v52, %v673_v59  ;;  %v617_v4 = vand.u32 2147483647, %v616_v60 }
 0x11d   : > { %v680_v5 = vcvt.s32.f32 %v679_v61  ;;  %v612_v7 = vsel %vm1141_vm3, %v611_v0, %v314_v31  ;;  %vm1155_vm5 = vcmp.lt.f32.partialorder %v613_v57, 8388608.0  ;;  %v677_v9 = vand.u32 2147483647, %v342_v49  ;;  %v324_v31 = vpop.f32.mrf.mxu0  ;;  %v350_v61 = vpop.f32.mrf.mxu1 }
 0x11e   : > { %v391_v6 = vmin.f32 %v375_v62, 255.0  ;;  %v399_v11 = vmin.f32 %v383_v2, 255.0  ;;  %v376_v12 = vmax.f32 %v612_v7, 0.0  ;;  %v676_v13 = vsel %vm1145_vm4, %v675_v3, %v338_v32 }
 0x11f   : > { %v619_v14 = vor.u32 %v618_v1, %v617_v4  ;;  %v384_v16 = vmax.f32 %v676_v13, 0.0  ;;  %v681_v17 = vand.u32 2147483647, %v680_v5  ;;  %v682_v18 = vand.u32 2147483648, %v342_v49  ;;  %v326_v52 = vpop.f32.mrf.mxu0 }
 0x120   : > { %v407_v15 = vmul.f32 0.0078, %v391_v6  ;;  %v415_v20 = vmul.f32 0.0078, %v399_v11  ;;  %v392_v21 = vmin.f32 %v376_v12, 255.0  ;;  %v623_v23 = vcvt.f32.s32 %v320_v10 }
 0x121   : > { %v620_v22 = vsel %vm1155_vm5, %v619_v14, %v318_v40  ;;  %v400_v24 = vmin.f32 %v384_v16, 255.0  ;;  %vm678_vm6 = vcmp.lt.f32.partialorder %v677_v9, 8388608.0  ;;  %v683_v26 = vor.u32 %v682_v18, %v681_v17 }
 0x122   : > { %423 = vst [vmem:[%s1165_s17] sm:$0xff] %v407_v15  ;;  %v377_v25 = vmax.f32 %v620_v22, 0.0  ;;  %431 = vst [vmem:[%s1165_s17 + $0x40] sm:$0xff] %v415_v20  ;;  %v408_v27 = vmul.f32 0.0078, %v392_v21  ;;  %v621_v28 = vand.u32 2147483647, %v320_v10  ;;  %v624_v29 = vcvt.s32.f32 %v623_v23 }
 0x123   : > { %v687_v30 = vcvt.f32.s32 %v344_v19  ;;  %v416_v32 = vmul.f32 0.0078, %v400_v24  ;;  %v684_v34 = vsel %vm678_vm6, %v683_v26, %v342_v49  ;;  %v685_v35 = vand.u32 2147483647, %v344_v19 }
 0x124   : > { %v393_v33 = vmin.f32 %v377_v25, 255.0  ;;  %424 = vst [vmem:[%s1165_s17 + $0x8] sm:$0xff] %v408_v27  ;;  %v385_v37 = vmax.f32 %v684_v34, 0.0  ;;  %v625_v38 = vand.u32 2147483647, %v624_v29  ;;  %v626_v39 = vand.u32 2147483648, %v320_v10  ;;  %v354_v27 = vpop.f32.mrf.mxu1 }
 0x125   : > { %v688_v40 = vcvt.s32.f32 %v687_v30  ;;  %432 = vst [vmem:[%s1165_s17 + $0x48] sm:$0xff] %v416_v32  ;;  %v690_v42 = vand.u32 2147483648, %v344_v19  ;;  %v629_v43 = vand.u32 2147483647, %v324_v31  ;;  %v631_v44 = vcvt.f32.s32 %v324_v31 }
 0x126   : > { %v409_v41 = vmul.f32 0.0078, %v393_v33  ;;  %v401_v45 = vmin.f32 %v385_v37, 255.0  ;;  %v627_v46 = vor.u32 %v626_v39, %v625_v38  ;;  %v693_v48 = vand.u32 2147483647, %v348_v36 }
 0x127   : > { %v689_v47 = vand.u32 2147483647, %v688_v40  ;;  %vm622_vm7 = vcmp.lt.f32.partialorder %v621_v28, 8388608.0  ;;  %vm1172_vm8 = vcmp.lt.f32.partialorder %v685_v35, 8388608.0  ;;  %v632_v50 = vcvt.s32.f32 %v631_v44 }
 0x128   : > { %425 = vst [vmem:[%s1165_s17 + $0x10] sm:$0xff] %v409_v41  ;;  %v695_v51 = vcvt.f32.s32 %v348_v36  ;;  %v417_v53 = vmul.f32 0.0078, %v401_v45  ;;  %v628_v54 = vsel %vm622_vm7, %v627_v46, %v320_v10  ;;  %v634_v56 = vand.u32 2147483648, %v324_v31  ;;  %v330_v10 = vpop.f32.mrf.mxu0 }
 0x129   : > { %v691_v55 = vor.u32 %v690_v42, %v689_v47  ;;  %v378_v57 = vmax.f32 %v628_v54, 0.0  ;;  %vm1176_vm9 = vcmp.lt.f32.partialorder %v629_v43, 8388608.0  ;;  %v633_v59 = vand.u32 2147483647, %v632_v50  ;;  %v356_v47 = vpop.f32.mrf.mxu1 }
 0x12a   : > { %v696_v60 = vcvt.s32.f32 %v695_v51  ;;  %433 = vst [vmem:[%s1165_s17 + $0x50] sm:$0xff] %v417_v53  ;;  %vm1183_vm10 = vcmp.lt.f32.partialorder %v693_v48, 8388608.0  ;;  %v698_v0 = vand.u32 2147483648, %v348_v36  ;;  %v639_v1 = vcvt.f32.s32 %v326_v52  ;;  %v332_v39 = vpop.f32.mrf.mxu0 }
 0x12b   : > { %v692_v62 = vsel %vm1172_vm8, %v691_v55, %v344_v19  ;;  %v394_v2 = vmin.f32 %v378_v57, 255.0  ;;  %v635_v4 = vor.u32 %v634_v56, %v633_v59  ;;  %v637_v6 = vand.u32 2147483647, %v326_v52 }
 0x12c   : > { %v386_v3 = vmax.f32 %v692_v62, 0.0  ;;  %v697_v5 = vand.u32 2147483647, %v696_v60  ;;  %v640_v7 = vcvt.s32.f32 %v639_v1  ;;  %v701_v8 = vand.u32 2147483647, %v350_v61 }
 0x12d   : > { %v703_v9 = vcvt.f32.s32 %v350_v61  ;;  %v410_v11 = vmul.f32 0.0078, %v394_v2  ;;  %v636_v13 = vsel %vm1176_vm9, %v635_v4, %v324_v31  ;;  %v642_v17 = vand.u32 2147483648, %v326_v52 }
 0x12e   : > { %v402_v12 = vmin.f32 %v386_v3, 255.0  ;;  %v699_v14 = vor.u32 %v698_v0, %v697_v5  ;;  %v379_v15 = vmax.f32 %v636_v13, 0.0  ;;  %v641_v16 = vand.u32 2147483647, %v640_v7 }
 0x12f   : > { %v704_v18 = vcvt.s32.f32 %v703_v9  ;;  %426 = vst [vmem:[%s1165_s17 + $0x18] sm:$0xff] %v410_v11  ;;  %v706_v21 = vand.u32 2147483648, %v350_v61  ;;  %v647_v22 = vcvt.f32.s32 %v330_v10  ;;  %vm638_vm11 = vcmp.lt.f32.partialorder %v637_v6, 8388608.0 }
 0x130   : > { %v418_v19 = vmul.f32 0.0078, %v402_v12  ;;  %v700_v20 = vsel %vm1183_vm10, %v699_v14, %v348_v36  ;;  %v395_v23 = vmin.f32 %v379_v15, 255.0  ;;  %v643_v25 = vor.u32 %v642_v17, %v641_v16 }
 0x131   : > { %v387_v24 = vmax.f32 %v700_v20, 0.0  ;;  %v705_v26 = vand.u32 2147483647, %v704_v18  ;;  %vm1193_vm12 = vcmp.lt.f32.partialorder %v701_v8, 8388608.0  ;;  %v645_v29 = vand.u32 2147483647, %v330_v10 }
 0x132   : > { %434 = vst [vmem:[%s1165_s17 + $0x58] sm:$0xff] %v418_v19  ;;  %v648_v30 = vcvt.s32.f32 %v647_v22  ;;  %v411_v31 = vmul.f32 0.0078, %v395_v23  ;;  %v644_v33 = vsel %vm638_vm11, %v643_v25, %v326_v52  ;;  %v650_v37 = vand.u32 2147483648, %v330_v10 }
 0x133   : > { %v403_v32 = vmin.f32 %v387_v24, 255.0  ;;  %v707_v34 = vor.u32 %v706_v21, %v705_v26  ;;  %v380_v35 = vmax.f32 %v644_v33, 0.0  ;;  %v711_v38 = vcvt.f32.s32 %v354_v27 }
 0x134   : > { %v649_v36 = vand.u32 2147483647, %v648_v30  ;;  %427 = vst [vmem:[%s1165_s17 + $0x20] sm:$0xff] %v411_v31  ;;  %v709_v42 = vand.u32 2147483647, %v354_v27  ;;  %vm646_vm13 = vcmp.lt.f32.partialorder %v645_v29, 8388608.0  ;;  %v655_v49 = vcvt.f32.s32 %v332_v39 }
 0x135   : > { %v419_v40 = vmul.f32 0.0078, %v403_v32  ;;  %v708_v41 = vsel %vm1193_vm12, %v707_v34, %v350_v61  ;;  %v396_v43 = vmin.f32 %v380_v35, 255.0  ;;  %v712_v46 = vcvt.s32.f32 %v711_v38 }
 0x136   : > { %v388_v44 = vmax.f32 %v708_v41, 0.0  ;;  %v651_v45 = vor.u32 %v650_v37, %v649_v36  ;;  %v714_v48 = vand.u32 2147483648, %v354_v27  ;;  %v656_v55 = vcvt.s32.f32 %v655_v49 }
 0x137   : > { %435 = vst [vmem:[%s1165_s17 + $0x60] sm:$0xff] %v419_v40  ;;  %v412_v50 = vmul.f32 0.0078, %v396_v43  ;;  %v713_v53 = vand.u32 2147483647, %v712_v46  ;;  %v719_v56 = vcvt.f32.s32 %v356_v47  ;;  %vm710_vm14 = vcmp.lt.f32.partialorder %v709_v42, 8388608.0 }
 0x138   : > { %v404_v51 = vmin.f32 %v388_v44, 255.0  ;;  %v652_v52 = vsel %vm646_vm13, %v651_v45, %v330_v10  ;;  %v653_v59 = vand.u32 2147483647, %v332_v39  ;;  %v657_v61 = vand.u32 2147483647, %v656_v55 }
 0x139   : > { %v381_v54 = vmax.f32 %v652_v52, 0.0  ;;  %428 = vst [vmem:[%s1165_s17 + $0x28] sm:$0xff] %v412_v50  ;;  %v715_v58 = vor.u32 %v714_v48, %v713_v53  ;;  %v658_v62 = vand.u32 2147483648, %v332_v39  ;;  %v720_v63 = vcvt.s32.f32 %v719_v56 }
 0x13a   : > { %v420_v57 = vmul.f32 0.0078, %v404_v51  ;;  %v717_v1 = vand.u32 2147483647, %v356_v47  ;;  %v722_v2 = vand.u32 2147483648, %v356_v47  ;;  %vm654_vm15 = vcmp.lt.f32.partialorder %v653_v59, 8388608.0 }
 0x13b   : > { %v397_v60 = vmin.f32 %v381_v54, 255.0  ;;  %v716_v0 = vsel %vm710_vm14, %v715_v58, %v354_v27  ;;  %v659_v5 = vor.u32 %v658_v62, %v657_v61  ;;  %v721_v6 = vand.u32 2147483647, %v720_v63 }
 0x13c   : > { %436 = vst [vmem:[%s1165_s17 + $0x68] sm:$0xff] %v420_v57  ;;  %v389_v4 = vmax.f32 %v716_v0, 0.0  ;;  %vm718_vm0 = vcmp.lt.f32.partialorder %v717_v1, 8388608.0 }
 0x13d   : > { %v413_v3 = vmul.f32 0.0078, %v397_v60  ;;  %v660_v8 = vsel %vm654_vm15, %v659_v5, %v332_v39  ;;  %v723_v9 = vor.u32 %v722_v2, %v721_v6 }
 0x13e   : > { %v405_v7 = vmin.f32 %v389_v4, 255.0  ;;  %v382_v10 = vmax.f32 %v660_v8, 0.0 }
 0x13f   : > { %429 = vst [vmem:[%s1165_s17 + $0x30] sm:$0xff] %v413_v3  ;;  %v724_v12 = vsel %vm718_vm0, %v723_v9, %v356_v47 }
 0x140   : > { %v421_v11 = vmul.f32 0.0078, %v405_v7  ;;  %v398_v13 = vmin.f32 %v382_v10, 255.0  ;;  %v390_v14 = vmax.f32 %v724_v12, 0.0 }
 0x142   : > { %437 = vst [vmem:[%s1165_s17 + $0x70] sm:$0xff] %v421_v11  ;;  %v414_v15 = vmul.f32 0.0078, %v398_v13  ;;  %v406_v16 = vmin.f32 %v390_v14, 255.0 }
 0x144   : > { %430 = vst [vmem:[%s1165_s17 + $0x38] sm:$0xff] %v414_v15  ;;  %v422_v17 = vmul.f32 0.0078, %v406_v16 }
 0x146   : > { %438 = vst [vmem:[%s1165_s17 + $0x78] sm:$0xff] %v422_v17 }
 0x147   : > { %872 = shalt.err (!%p869_p5)
}
 0x148   : > { %s873_s3 = scalar_lea.hbm %s1210_s27, 2048  ;;  %s877_s8 = scalar_lea.hbm %s1264_s2, 4096 }
 0x149   : > { %p874_p7 = scmp.ne.s32.totalorder %s1210_s27, %s873_s3  ;;  %p878_p9 = scmp.lt.s32.totalorder %s1210_s27, %s1264_s2 }
 0x14a   : > { %p879_p11 = scmp.lt.s32.totalorder %s877_s8, %s873_s3 }
 0x14b   : > { %p875_p6 = pnand %p874_p7, %p1057_p13 }
 0x14c   : > { %p880_p10 = por %p879_p11, %p878_p9 }
 0x14d   : > { %p876_p4 = pneg %p875_p6 }
 0x14f   : > { %p881_p1 = pnand %p880_p10, %p876_p4 }
 0x151   : > { %884 = shalt.err (!%p881_p1)
}
 0x152   : > { %s953_s23 = smov 256   ;;  %s954_s17 = smov 16  }
 0x153   : > { %731 = dma.vmem_to_hbm [thread:$0]  (%p1057_p13), %s1212_s21, 2048, %s1210_s27, %s440_s18, %s953_s23, %s953_s23, %s954_s17  }
 0x154 PF: > { %s470_s19 = sand.u32 1, %s923_s9   ;;  %p1294_p8 = scmp.ne.s32.totalorder %s1269_s20, 0 }
 0x155   : > { %p1295_p12 = scmp.ge.s32.totalorder %s943_s14, 2  ;;  %s471_s24 = scalar_lea.sflag [#allocation4], %s470_s19 }
 0x157   : > { %p742_p0 = pnand %p1295_p12, %p1294_p8 }
 0x159   : > { %p743_p2 = pneg %p742_p0 }
 0x15b   : > { %918 = dma.done.wait (%p743_p2), %s471_s24, 2048  }
 0x15c   : > { %920 = vsyncadd (%p743_p2), %s471_s24, 4294965248  ;;  %s19_s14 = sadd.s32 1, %s943_s14   ;;  %s1296_s9 = smov %s927_s10 }
 0x15d   : > { %p16_p3 = scmp.ge.s32.totalorder %s19_s14, 4   ;;  %s1297_s10 = smov %s931_s11 }
 0x15e   : > { %s1298_s11 = smov %s1066_s15  ;;  %s1299_s12 = smov %s939_s13 }
 0x15f   : > { %s1300_s13 = smov %s1302_s25  ;;  %18 = sbr.rel (!%p16_p3) target bundleno = 7 (0x7), region = 78 }
 0x164   :  { %476 = vsyncpa [#allocation3], 1 }
 0x165   :  { %478 = vsyncpa [#allocation3 + $0x1], 1 }
 0x166   :  { %479 = vsyncpa [#allocation6], 1 }
 0x167   :  { %481 = vsyncpa [#allocation6 + $0x1], 1 }
 0x168   :  { %482 = vsyncpa [#allocation4], 1 }
 0x169   :  { %484 = vsyncpa [#allocation4 + $0x1], 1 }

</bundles_post_ra>
